<compile_context>
chip_gen: v7x
topology: tpu7x:2x2x1
jax: 0.10.0
libtpu: 0.0.40
codegen_flags: <defaults>
</compile_context>

<pallas_src>
import math

import jax
import jax.numpy as jnp
from jax.experimental import pallas as pl
from jax.experimental.pallas import tpu as pltpu


# -----------------------------------------------------------------------------
# Fixed "weights" of the module (deterministic, from gdl_loss). The conv bias
# cancels in the gt - gen subtraction, so no bias parameter is needed.
# -----------------------------------------------------------------------------
FILTER_X = jnp.array(
    [[[[-1, 1, 0]], [[0, 0, 0]], [[0, 0, 0]]],
     [[[0, 0, 0]], [[-1, 1, 0]], [[0, 0, 0]]],
     [[[0, 0, 0]], [[0, 0, 0]], [[-1, 1, 0]]]], dtype=jnp.float32)       # (3,3,1,3)

FILTER_Y = jnp.array(
    [[[[-1], [1], [0]], [[0], [0], [0]], [[0], [0], [0]]],
     [[[0], [0], [0]], [[-1], [1], [0]], [[0], [0], [0]]],
     [[[0], [0], [0]], [[0], [0], [0]], [[-1], [1], [0]]]], dtype=jnp.float32)  # (3,3,3,1)


# -----------------------------------------------------------------------------
# Pallas kernel
# -----------------------------------------------------------------------------
def gdl_loss_pallas(gen_frames, gt_frames, alpha=2,
                    target_block_bytes=2 * 1024 * 1024):
    assert alpha == 2, "kernel specializes the default alpha=2 (square)"
    N, C, H, W = gen_frames.shape
    assert gt_frames.shape == (N, C, H, W)

    n_slices = N * C
    total_rows = n_slices * H

    # Keep the native dtype over the HBM->VMEM DMA; cast to f32 inside the
    # kernel (free VPU op).  Flatten batch*channel*H onto the sublane axis.
    gen_f = gen_frames.reshape(total_rows, W)
    gt_f = gt_frames.reshape(total_rows, W)

    # ----- block sizing: batch whole (H, W) slices up to ~target bytes/buffer -----
    rows_target = max(1, target_block_bytes // (W * 4))          # sized as f32
    slices_per_block = max(1, min(n_slices, rows_target // H))
    if slices_per_block < n_slices:
        # Non-full blocks: block row-count must be a multiple of 8 (sublanes).
        m = 8 // math.gcd(H, 8)
        slices_per_block = min(n_slices,
                               ((slices_per_block + m - 1) // m) * m)

    padded_slices = math.ceil(n_slices / slices_per_block) * slices_per_block
    if padded_slices != n_slices:
        # Zero-padded slices give diff == 0 -> dx == dy == 0 -> zero contribution.
        pad_rows = (padded_slices - n_slices) * H
        gen_f = jnp.pad(gen_f, ((0, pad_rows), (0, 0)))
        gt_f = jnp.pad(gt_f, ((0, pad_rows), (0, 0)))

    block_rows = slices_per_block * H
    num_blocks = padded_slices // slices_per_block
    denom = float(2 * N * C * H * W)   # mean over stack([grad_diff_x, grad_diff_y])

    def kernel(gen_ref, gt_ref, out_ref):
        # Linear conv + shared bias => gt_d? - gen_d? == D_?(gt - gen).
        diff = gt_ref[...].astype(jnp.float32) - gen_ref[...].astype(jnp.float32)

        # D_x: backward difference along W (lane axis), zero padding at w == 0.
        sx = pltpu.roll(diff, shift=1, axis=1)
        col = jax.lax.broadcasted_iota(jnp.int32, (block_rows, W), 1)
        dx = jnp.where(col == 0, diff, diff - sx)

        # D_y: backward difference along H (sublane axis), zero padding at the
        # first row of each (H, W) slice.  Blocks are aligned to slice
        # boundaries, so the block-local row index mod H identifies those rows
        # (and also masks the roll's block-boundary wraparound).
        sy = pltpu.roll(diff, shift=1, axis=0)
        row = jax.lax.broadcasted_iota(jnp.int32, (block_rows, W), 0)
        dy = jnp.where(row % H == 0, diff, diff - sy)

        # alpha == 2 -> |.|^2 == square.  One f32 partial sum per block,
        # written into the whole-grid-resident SMEM output vector.
        out_ref[pl.program_id(0)] = jnp.sum(dx * dx + dy * dy)

    partials = pl.pallas_call(
        kernel,
        out_shape=jax.ShapeDtypeStruct((num_blocks,), jnp.float32),
        grid_spec=pltpu.PrefetchScalarGridSpec(
            num_scalar_prefetch=0,
            grid=(num_blocks,),
            in_specs=[
                pl.BlockSpec((block_rows, W), lambda i: (i, 0)),
                pl.BlockSpec((block_rows, W), lambda i: (i, 0)),
            ],
            out_specs=pl.BlockSpec(memory_space=pltpu.MemorySpace.SMEM),
        ),
        compiler_params=pltpu.CompilerParams(
            dimension_semantics=("arbitrary",)),
    )(gen_f, gt_f)

    # Tiny final reduction + mean normalization (per-block sums are exact
    # tree-adds in f32; this sum is over at most a few thousand partials).
    return jnp.sum(partials) / denom


# -----------------------------------------------------------------------------
# Pure-JAX reference (literal translation of the PyTorch code, using the
# explicit conv weights) for verification.
# -----------------------------------------------------------------------------
def gdl_loss_ref(gen, gt, alpha=2):
    dn = ("NCHW", "OIHW", "NCHW")

    def conv(x, w, pad):
        return jax.lax.conv_general_dilated(
            x, w, window_strides=(1, 1), padding=pad, dimension_numbers=dn)

    gen_dx = conv(gen, FILTER_X, [(0, 0), (1, 1)])
    gt_dx = conv(gt, FILTER_X, [(0, 0), (1, 1)])
    gen_dy = conv(gen, FILTER_Y, [(1, 1), (0, 0)])
    gt_dy = conv(gt, FILTER_Y, [(1, 1), (0, 0)])

    grad_diff_x = jnp.abs(gt_dx - gen_dx) ** alpha
    grad_diff_y = jnp.abs(gt_dy - gen_dy) ** alpha
    return jnp.mean(jnp.stack([grad_diff_x, grad_diff_y]))


if __name__ == "__main__":
    key = jax.random.PRNGKey(0)
    k1, k2 = jax.random.split(key)
    # NCHW, C must be 3 (the fixed conv filters are 3->3 channel)
    gen_frames = jax.random.normal(k1, (2, 3, 16, 16), dtype=jnp.float32)
    gt_frames = jax.random.normal(k2, (2, 3, 16, 16), dtype=jnp.float32)

    ref = gdl_loss_ref(gen_frames, gt_frames)

    # Default block sizing: whole problem fits in one block.
    loss = gdl_loss_pallas(gen_frames, gt_frames)
    jax.block_until_ready(loss)
    assert jnp.allclose(loss, ref, rtol=1e-5, atol=1e-5), (loss, ref)

    # Tiny block target: exercises the multi-block + zero-padding path and the
    # per-block partial-sum SMEM writes.
    loss_mb = gdl_loss_pallas(gen_frames, gt_frames, target_block_bytes=4096)
    jax.block_until_ready(loss_mb)
    assert jnp.allclose(loss_mb, ref, rtol=1e-5, atol=1e-5), (loss_mb, ref)

    print("KERNEL_OK")
</pallas_src>

<mosaic_0001>
module attributes {stable_mosaic.version = 11 : i64} {
  func.func @kernel(%arg0: i32, %arg1: memref<96x16xf32, #tpu.memory_space<vmem>>, %arg2: memref<96x16xf32, #tpu.memory_space<vmem>>, %arg3: memref<1xf32, #tpu.memory_space<smem>>) attributes {dimension_semantics = [#tpu.dimension_semantics<arbitrary>], iteration_bounds = array<i64: 1>, scalar_prefetch = 0 : i64, scratch_operands = 0 : i64, tpu.core_type = #tpu.core_type<tc>, window_params = [{transform_indices = @transform_0, window_bounds = array<i64: 96, 16>}, {transform_indices = @transform_1, window_bounds = array<i64: 96, 16>}, {transform_indices = @transform_2, window_bounds = array<i64: 1>}]} {
    %c0 = arith.constant 0 : index
    %c0_0 = arith.constant 0 : index
    %0 = vector.load %arg2[%c0, %c0_0] : memref<96x16xf32, #tpu.memory_space<vmem>>, vector<96x16xf32>
    %c0_1 = arith.constant 0 : index
    %c0_2 = arith.constant 0 : index
    %1 = vector.load %arg1[%c0_1, %c0_2] : memref<96x16xf32, #tpu.memory_space<vmem>>, vector<96x16xf32>
    %2 = arith.subf %0, %1 : vector<96x16xf32>
    %c1_i32 = arith.constant 1 : i32
    %3 = tpu.dynamic_rotate %2 by %c1_i32 dim 1 : vector<96x16xf32>, i32 -> vector<96x16xf32>
    %4 = tpu.iota {dimensions = array<i32: 1>} : vector<96x16xi32>
    %c0_i32 = arith.constant 0 : i32
    %5 = vector.broadcast %c0_i32 : i32 to vector<96x16xi32>
    %6 = arith.cmpi eq, %4, %5 : vector<96x16xi32>
    %7 = arith.subf %2, %3 : vector<96x16xf32>
    %8 = arith.select %6, %2, %7 : vector<96x16xi1>, vector<96x16xf32>
    %c1_i32_3 = arith.constant 1 : i32
    %9 = tpu.dynamic_rotate %2 by %c1_i32_3 dim 0 : vector<96x16xf32>, i32 -> vector<96x16xf32>
    %10 = tpu.iota {dimensions = array<i32: 0>} : vector<96x16xi32>
    %c16_i32 = arith.constant 16 : i32
    %c0_i32_4 = arith.constant 0 : i32
    %11 = arith.cmpi eq, %c16_i32, %c0_i32_4 : i32
    %c1_i32_5 = arith.constant 1 : i32
    %12 = arith.select %11, %c1_i32_5, %c16_i32 : i32
    %13 = vector.broadcast %12 : i32 to vector<96x16xi32>
    %14 = arith.remsi %10, %13 : vector<96x16xi32>
    %c0_i32_6 = arith.constant 0 : i32
    %15 = vector.broadcast %c0_i32_6 : i32 to vector<96x16xi32>
    %16 = arith.cmpi ne, %14, %15 : vector<96x16xi32>
    %c0_i32_7 = arith.constant 0 : i32
    %17 = vector.broadcast %c0_i32_7 : i32 to vector<96x16xi32>
    %18 = arith.cmpi slt, %14, %17 : vector<96x16xi32>
    %c0_i32_8 = arith.constant 0 : i32
    %19 = arith.cmpi slt, %12, %c0_i32_8 : i32
    %20 = vector.broadcast %19 : i1 to vector<96x16xi1>
    %21 = vector.broadcast %20 : vector<96x16xi1> to vector<96x16xi1>
    %22 = arith.xori %18, %21 : vector<96x16xi1>
    %23 = arith.andi %22, %16 : vector<96x16xi1>
    %24 = vector.broadcast %12 : i32 to vector<96x16xi32>
    %25 = arith.addi %14, %24 : vector<96x16xi32>
    %26 = arith.select %23, %25, %14 : vector<96x16xi1>, vector<96x16xi32>
    %c0_i32_9 = arith.constant 0 : i32
    %27 = vector.broadcast %c0_i32_9 : i32 to vector<96x16xi32>
    %28 = arith.cmpi eq, %26, %27 : vector<96x16xi32>
    %29 = arith.subf %2, %9 : vector<96x16xf32>
    %30 = arith.select %28, %2, %29 : vector<96x16xi1>, vector<96x16xf32>
    %31 = arith.mulf %8, %8 : vector<96x16xf32>
    %32 = arith.mulf %30, %30 : vector<96x16xf32>
    %33 = arith.addf %31, %32 : vector<96x16xf32>
    %34 = vector.shape_cast %33 : vector<96x16xf32> to vector<1x96x16xf32>
    %cst = arith.constant dense<0.000000e+00> : vector<1xf32>
    %35 = vector.multi_reduction <add>, %34, %cst [1, 2] : vector<1x96x16xf32> to vector<1xf32>
    %36 = vector.shape_cast %35 : vector<1xf32> to vector<1x1x1xf32>
    %37 = vector.extract %36[0, 0, 0] : f32 from vector<1x1x1xf32>
    %38 = arith.index_cast %arg0 : i32 to index
    %39 = memref.load %arg3[%38] : memref<1xf32, #tpu.memory_space<smem>>
    memref.store %37, %arg3[%38] : memref<1xf32, #tpu.memory_space<smem>>
    return
  }
  func.func @transform_0(%arg0: i32) -> (i32, i32) {
    %c0_i32 = arith.constant 0 : i32
    %c0_i32_0 = arith.constant 0 : i32
    return %arg0, %c0_i32 : i32, i32
  }
  func.func @transform_1(%arg0: i32) -> (i32, i32) {
    %c0_i32 = arith.constant 0 : i32
    %c0_i32_0 = arith.constant 0 : i32
    return %arg0, %c0_i32 : i32, i32
  }
  func.func @transform_2(%arg0: i32) -> i32 {
    %c0_i32 = arith.constant 0 : i32
    %c0_i32_0 = arith.constant 0 : i32
    return %c0_i32 : i32
  }
}

</mosaic_0001>

<bundles_post_ra>
// kernel: tpu_custom_call.1
= control target key start
LH: loop header
LB: loop body
LE: loop exit
PB: predicated region body
PF: predicated region fallthrough
CT: control target
= control target key end

     0   :  { %s515_s25 = smov 16   ;;  %s883_s0 = inlined_call_operand.vmem [shape: f32[96,16], index: 0, kind: input, shape index: {}]   ;;  %s884_s1 = inlined_call_operand.vmem [shape: f32[96,16], index: 1, kind: input, shape index: {}]   ;;  %s885_s2 = inlined_call_operand.hbm [shape: f32[1], index: 2, kind: output, shape index: {}]  }
   0x1   :  { %v12_v0 = vld [vmem:[%s884_s1] sm:$0xff]  ;;  %v14_v2 = vld [vmem:[%s884_s1 + $0x10] sm:$0xff]  ;;  %v13_v5 = vld [vmem:[%s884_s1 + $0x8] sm:$0xff] }
   0x2   :  { %v24_v1 = vld [vmem:[%s883_s0] sm:$0xff]  ;;  %v26_v4 = vld [vmem:[%s883_s0 + $0x10] sm:$0xff]  ;;  %v25_v6 = vld [vmem:[%s883_s0 + $0x8] sm:$0xff] }
   0x3   :  { %v542_v3 = vsub.f32 %v12_v0, %v24_v1  ;;  %v553_v7 = vsub.f32 %v14_v2, %v26_v4  ;;  %v15_v8 = vld [vmem:[%s884_s1 + $0x18] sm:$0xff]  ;;  %v563_v10 = vsub.f32 %v13_v5, %v25_v6  ;;  %v16_v12 = vld [vmem:[%s884_s1 + $0x20] sm:$0xff]  ;;  %v17_v14 = vld [vmem:[%s884_s1 + $0x28] sm:$0xff] }
   0x4   :  { %v27_v9 = vld [vmem:[%s883_s0 + $0x18] sm:$0xff]  ;;  %v28_v13 = vld [vmem:[%s883_s0 + $0x20] sm:$0xff]  ;;  %v29_v15 = vld [vmem:[%s883_s0 + $0x28] sm:$0xff] }
   0x5   :  { %49 = vrot.lane.b32.xlu0 %v542_v3, %s515_s25  ;;  %55 = vrot.lane.b32.xlu1 %v553_v7, %s515_s25  ;;  %v567_v11 = vsub.f32 %v15_v8, %v27_v9  ;;  %v583_v16 = vsub.f32 %v16_v12, %v28_v13  ;;  %v587_v17 = vsub.f32 %v17_v14, %v29_v15  ;;  %v18_v18 = vld [vmem:[%s884_s1 + $0x30] sm:$0xff] }
   0x6   :  { %v30_v19 = vld [vmem:[%s883_s0 + $0x30] sm:$0xff] }
   0x9   :  { %52 = vrot.lane.b32.xlu0 %v563_v10, %s515_s25  ;;  %58 = vrot.lane.b32.xlu1 %v567_v11, %s515_s25 }
   0xa   :  { %7 = vsyncpa [#allocation3], 0  ;;  %v19_v20 = vld [vmem:[%s884_s1 + $0x38] sm:$0xff]  ;;  %v603_v22 = vsub.f32 %v18_v18, %v30_v19  ;;  %v20_v24 = vld [vmem:[%s884_s1 + $0x40] sm:$0xff]  ;;  %vm48_vm0 = vcmask 1047680   ;;  %vm450_vm5 = vcmask 130048  }
   0xb   :  { %v31_v21 = vld [vmem:[%s883_s0 + $0x38] sm:$0xff]  ;;  %v32_v25 = vld [vmem:[%s883_s0 + $0x40] sm:$0xff]  ;;  %v21_v26 = vld [vmem:[%s884_s1 + $0x48] sm:$0xff]  ;;  %s503_s4 = scalar_lea.hbm %s885_s2, 16 }
   0xc   :  { %v607_v23 = vsub.f32 %v19_v20, %v31_v21  ;;  %v33_v27 = vld [vmem:[%s883_s0 + $0x48] sm:$0xff]  ;;  %v623_v28 = vsub.f32 %v20_v24, %v32_v25  ;;  %v22_v30 = vld [vmem:[%s884_s1 + $0x50] sm:$0xff]  ;;  %v23_v32 = vld [vmem:[%s884_s1 + $0x58] sm:$0xff]  ;;  %p504_p0 = scmp.ne.s32.totalorder %s885_s2, %s503_s4  ;;  %p507_p1 = scmp.lt.u32.totalorder %s503_s4, %s885_s2 }
   0xd   :  { %61 = vrot.lane.b32.xlu0 %v583_v16, %s515_s25  ;;  %64 = vrot.lane.b32.xlu1 %v587_v17, %s515_s25  ;;  %v627_v29 = vsub.f32 %v21_v26, %v33_v27  ;;  %v34_v31 = vld [vmem:[%s883_s0 + $0x50] sm:$0xff]  ;;  %v35_v33 = vld [vmem:[%s883_s0 + $0x58] sm:$0xff]  ;;  %s516_s0 = smov 113  }
   0xe   :  { %v643_v34 = vsub.f32 %v22_v30, %v34_v31  ;;  %v647_v35 = vsub.f32 %v23_v32, %v35_v33  ;;  %v121_v30 = vlaneseq  ;;  %v196_v33 = vrot.slane %v542_v3, 7  ;;  %p509_p2 = pnand %p507_p1, %p504_p0 }
  0x10   :  { %v725_v31 = vshrl.u32 %v121_v30, 7  ;;  %v207_v32 = vrot.slane %v647_v35, 7 }
  0x11   :  { %67 = vrot.lane.b32.xlu0 %v603_v22, %s515_s25  ;;  %70 = vrot.lane.b32.xlu1 %v607_v23, %s515_s25 }
  0x12   :  { %vm210_vm1 = vcmp.lt.s32.totalorder %v725_v31, 1 }
  0x15   :  { %73 = vrot.lane.b32.xlu0 %v623_v28, %s515_s25  ;;  %76 = vrot.lane.b32.xlu1 %v627_v29, %s515_s25 }
  0x19   :  { %79 = vrot.lane.b32.xlu0 %v643_v34, %s515_s25  ;;  %82 = vrot.lane.b32.xlu1 %v647_v35, %s515_s25 }
  0x77   :  { %v50_v36 = vpop.permute.xlu0 %49  ;;  %v56_v38 = vpop.permute.xlu1 %55 }
  0x78   :  { %v51_v37 = vsel %vm48_vm0, %v50_v36, %v542_v3  ;;  %v57_v39 = vsel %vm48_vm0, %v56_v38, %v553_v7  ;;  %v197_v36 = vrot.slane %v563_v10, 7  ;;  %v224_v38 = vadd.s32 16, %v725_v31 }
  0x79   :  { %85 = vrot.lane.b32.xlu0 %v51_v37, %s515_s25  ;;  %v198_v37 = vrot.slane %v553_v7, 7 }
  0x7b   :  { %v53_v40 = vpop.permute.xlu0 %52  ;;  %v59_v42 = vpop.permute.xlu1 %58 }
  0x7c   :  { %v54_v41 = vsel %vm48_vm0, %v53_v40, %v563_v10  ;;  %v60_v43 = vsel %vm48_vm0, %v59_v42, %v567_v11  ;;  %v222_v40 = vsel %vm210_vm1, %v207_v32, %v196_v33  ;;  %v199_v42 = vrot.slane %v567_v11, 7 }
  0x7d   :  { %89 = vrot.lane.b32.xlu0 %v57_v39, %s515_s25  ;;  %87 = vrot.lane.b32.xlu1 %v54_v41, %s515_s25  ;;  %v238_v39 = vand.u32 15, %v725_v31  ;;  %v220_v41 = vsel %vm210_vm1, %v197_v36, %v198_v37 }
  0x7f   :  { %v62_v44 = vpop.permute.xlu0 %61  ;;  %v65_v45 = vpop.permute.xlu1 %64  ;;  %vm378_vm2 = vcmp.eq.s32.totalorder %v238_v39, 0 }
  0x80   :  { %v63_v46 = vsel %vm48_vm0, %v62_v44, %v583_v16  ;;  %v66_v47 = vsel %vm48_vm0, %v65_v45, %v587_v17  ;;  %v226_v44 = vadd.s32 32, %v725_v31  ;;  %v252_v45 = vand.u32 15, %v224_v38 }
  0x81   :  { %91 = vrot.lane.b32.xlu1 %v60_v43, %s515_s25  ;;  %93 = vrot.lane.b32.xlu0 %v63_v46, %s515_s25  ;;  %v200_v43 = vrot.slane %v583_v16, 7  ;;  %v201_v46 = vrot.slane %v587_v17, 7  ;;  %v205_v38 = vrot.slane %v627_v29, 7 }
  0x82   :  { %vm380_vm3 = vcmp.eq.s32.totalorder %v252_v45, 0 }
  0x83   :  { %v68_v48 = vpop.permute.xlu0 %67  ;;  %v71_v49 = vpop.permute.xlu1 %70 }
  0x84   :  { %v69_v50 = vsel %vm48_vm0, %v68_v48, %v603_v22  ;;  %v72_v51 = vsel %vm48_vm0, %v71_v49, %v607_v23  ;;  %v228_v48 = vadd.s32 48, %v725_v31  ;;  %v390_v49 = vsub.f32 %v542_v3, %v222_v40 }
  0x85   :  { %95 = vrot.lane.b32.xlu1 %v66_v47, %s515_s25  ;;  %97 = vrot.lane.b32.xlu0 %v69_v50, %s515_s25  ;;  %v202_v47 = vrot.slane %v603_v22, 7  ;;  %v747_v50 = vand.u32 127, %v121_v30 }
  0x87   :  { %v74_v52 = vpop.permute.xlu0 %73  ;;  %v77_v53 = vpop.permute.xlu1 %76  ;;  %vm123_vm4 = vcmp.eq.s32.totalorder %v747_v50, 0 }
  0x88   :  { %v75_v54 = vsel %vm48_vm0, %v74_v52, %v623_v28  ;;  %v78_v55 = vsel %vm48_vm0, %v77_v53, %v627_v29  ;;  %v392_v52 = vsub.f32 %v553_v7, %v220_v41  ;;  %v219_v53 = vsel %vm210_vm1, %v198_v37, %v199_v42 }
  0x89   :  { %99 = vrot.lane.b32.xlu1 %v72_v51, %s515_s25  ;;  %101 = vrot.lane.b32.xlu0 %v75_v54, %s515_s25  ;;  %v221_v51 = vsel %vm210_vm1, %v196_v33, %v197_v36  ;;  %v218_v54 = vsel %vm210_vm1, %v199_v42, %v200_v43  ;;  %v206_v41 = vrot.slane %v643_v34, 7  ;;  %v232_v42 = vadd.s32 80, %v725_v31 }
  0x8b   :  { %v80_v56 = vpop.permute.xlu0 %79  ;;  %v83_v57 = vpop.permute.xlu1 %82  ;;  %v211_v36 = vsel %vm210_vm1, %v206_v41, %v207_v32 }
  0x8c   :  { %v81_v58 = vsel %vm48_vm0, %v80_v56, %v643_v34  ;;  %v84_v59 = vsel %vm48_vm0, %v83_v57, %v647_v35  ;;  %v216_v56 = vsel %vm210_vm1, %v201_v46, %v202_v47  ;;  %v280_v57 = vand.u32 15, %v228_v48 }
  0x8d   :  { %103 = vrot.lane.b32.xlu1 %v78_v55, %s515_s25  ;;  %105 = vrot.lane.b32.xlu0 %v81_v58, %s515_s25  ;;  %v266_v55 = vand.u32 15, %v226_v44  ;;  %v230_v58 = vadd.s32 64, %v725_v31 }
  0x8e   :  { %vm384_vm7 = vcmp.eq.s32.totalorder %v280_v57, 0 }
  0x8f   :  { %vm382_vm6 = vcmp.eq.s32.totalorder %v266_v55, 0 }
  0x91   :  { %107 = vrot.lane.b32.xlu1 %v84_v59, %s515_s25  ;;  %v402_v59 = vsel %vm378_vm2, %v542_v3, %v390_v49 }
  0xeb   :  { %v86_v60 = vpop.permute.xlu0 %85 }
  0xec   :  { %v109_v61 = vsel %vm48_vm0, %v86_v60, %v542_v3  ;;  %v391_v60 = vsub.f32 %v563_v10, %v221_v51 }
  0xed   :  { %136 = vrot.lane.b32.xlu0 %v109_v61, %s516_s0  ;;  %v203_v61 = vrot.slane %v607_v23, 7 }
  0xef   :  { %v88_v62 = vpop.permute.xlu1 %87  ;;  %v90_v63 = vpop.permute.xlu0 %89 }
  0xf0   :  { %v110_v0 = vsel %vm48_vm0, %v88_v62, %v563_v10  ;;  %v111_v1 = vsel %vm48_vm0, %v90_v63, %v553_v7  ;;  %v204_v62 = vrot.slane %v623_v28, 7 }
  0xf1   :  { %138 = vrot.lane.b32.xlu1 %v110_v0, %s516_s0  ;;  %140 = vrot.lane.b32.xlu0 %v111_v1, %s516_s0  ;;  %v393_v0 = vsub.f32 %v567_v11, %v219_v53  ;;  %v394_v1 = vsub.f32 %v583_v16, %v218_v54 }
  0xf3   :  { %v92_v2 = vpop.permute.xlu1 %91  ;;  %v94_v4 = vpop.permute.xlu0 %93 }
  0xf4   :  { %v112_v5 = vsel %vm48_vm0, %v92_v2, %v567_v11  ;;  %v113_v6 = vsel %vm48_vm0, %v94_v4, %v583_v16  ;;  %v404_v4 = vsel %vm380_vm3, %v553_v7, %v392_v52 }
  0xf5   :  { %142 = vrot.lane.b32.xlu1 %v112_v5, %s516_s0  ;;  %144 = vrot.lane.b32.xlu0 %v113_v6, %s516_s0  ;;  %v396_v5 = vsub.f32 %v603_v22, %v216_v56  ;;  %v426_v6 = vmul.f32 %v402_v59, %v402_v59  ;;  %v308_v59 = vand.u32 15, %v232_v42 }
  0xf7   :  { %v96_v8 = vpop.permute.xlu1 %95  ;;  %v98_v9 = vpop.permute.xlu0 %97  ;;  %v408_v30 = vsel %vm384_vm7, %v603_v22, %v396_v5  ;;  %vm829_vm9 = vcmp.eq.s32.totalorder %v308_v59, 0 }
  0xf8   :  { %v114_v12 = vsel %vm48_vm0, %v96_v8, %v587_v17  ;;  %v115_v13 = vsel %vm48_vm0, %v98_v9, %v603_v22  ;;  %v217_v8 = vsel %vm210_vm1, %v200_v43, %v201_v46  ;;  %v294_v9 = vand.u32 15, %v230_v58 }
  0xf9   :  { %146 = vrot.lane.b32.xlu1 %v114_v12, %s516_s0  ;;  %148 = vrot.lane.b32.xlu0 %v115_v13, %s516_s0  ;;  %v427_v13 = vmul.f32 %v391_v60, %v391_v60  ;;  %v212_v58 = vsel %vm210_vm1, %v205_v38, %v206_v41 }
  0xfa   :  { %vm786_vm8 = vcmp.eq.s32.totalorder %v294_v9, 0 }
  0xfb   :  { %v100_v14 = vpop.permute.xlu1 %99  ;;  %v102_v15 = vpop.permute.xlu0 %101 }
  0xfc   :  { %v116_v18 = vsel %vm48_vm0, %v100_v14, %v607_v23  ;;  %v117_v19 = vsel %vm48_vm0, %v102_v15, %v623_v28  ;;  %v215_v14 = vsel %vm210_vm1, %v202_v47, %v203_v61  ;;  %v214_v15 = vsel %vm210_vm1, %v203_v61, %v204_v62 }
  0xfd   :  { %150 = vrot.lane.b32.xlu1 %v116_v18, %s516_s0  ;;  %152 = vrot.lane.b32.xlu0 %v117_v19, %s516_s0  ;;  %v397_v33 = vsub.f32 %v607_v23, %v215_v14  ;;  %v398_v37 = vsub.f32 %v623_v28, %v214_v15 }
  0xff   :  { %v104_v20 = vpop.permute.xlu1 %103  ;;  %v106_v21 = vpop.permute.xlu0 %105  ;;  %v433_v55 = vmul.f32 %v397_v33, %v397_v33 }
 0x100   :  { %v118_v24 = vsel %vm48_vm0, %v104_v20, %v627_v29  ;;  %v119_v25 = vsel %vm48_vm0, %v106_v21, %v643_v34  ;;  %v428_v20 = vmul.f32 %v404_v4, %v404_v4 }
 0x101   :  { %154 = vrot.lane.b32.xlu1 %v118_v24, %s516_s0  ;;  %156 = vrot.lane.b32.xlu0 %v119_v25, %s516_s0  ;;  %v429_v24 = vmul.f32 %v393_v0, %v393_v0  ;;  %v406_v25 = vsel %vm382_vm6, %v583_v16, %v394_v1 }
 0x102   :  { %v430_v47 = vmul.f32 %v406_v25, %v406_v25 }
 0x103   :  { %v108_v26 = vpop.permute.xlu1 %107 }
 0x104   :  { %v120_v27 = vsel %vm48_vm0, %v108_v26, %v647_v35 }
 0x105   :  { %158 = vrot.lane.b32.xlu1 %v120_v27, %s516_s0  ;;  %v395_v27 = vsub.f32 %v587_v17, %v217_v8 }
 0x107   :  { %v431_v52 = vmul.f32 %v395_v27, %v395_v27 }
 0x15f   :  { %v137_v63 = vpop.permute.xlu0 %136 }
 0x160   :  { %v172_v2 = vsub.f32 %v542_v3, %v137_v63 }
 0x162   :  { %v184_v12 = vsel %vm123_vm4, %v542_v3, %v172_v2 }
 0x163   :  { %v414_v18 = vmul.f32 %v184_v12, %v184_v12  ;;  %v139_v19 = vpop.permute.xlu1 %138  ;;  %v141_v21 = vpop.permute.xlu0 %140  ;;  %v400_v12 = vsub.f32 %v643_v34, %v212_v58 }
 0x164   :  { %v173_v26 = vsub.f32 %v563_v10, %v139_v19  ;;  %v174_v3 = vsub.f32 %v553_v7, %v141_v21 }
 0x165   :  { %v438_v43 = vadd.f32 %v426_v6, %v414_v18 }
 0x166   :  { %v185_v39 = vsel %vm123_vm4, %v563_v10, %v173_v26  ;;  %v186_v40 = vsel %vm123_vm4, %v553_v7, %v174_v3  ;;  %v432_v10 = vmul.f32 %v408_v30, %v408_v30  ;;  %v410_v7 = vsel %vm786_vm8, %v623_v28, %v398_v37 }
 0x167   :  { %v415_v44 = vmul.f32 %v185_v39, %v185_v39  ;;  %v416_v45 = vmul.f32 %v186_v40, %v186_v40  ;;  %v143_v46 = vpop.permute.xlu1 %142  ;;  %v145_v48 = vpop.permute.xlu0 %144  ;;  %v451_v60 = vsel %vm450_vm5, %v438_v43, 0.0  ;;  %v434_v33 = vmul.f32 %v410_v7, %v410_v7 }
 0x168   :  { %v175_v49 = vsub.f32 %v567_v11, %v143_v46  ;;  %v176_v51 = vsub.f32 %v583_v16, %v145_v48  ;;  %v412_v40 = vsel %vm829_vm9, %v643_v34, %v400_v12 }
 0x169   :  { %v439_v53 = vadd.f32 %v427_v13, %v415_v44  ;;  %v440_v54 = vadd.f32 %v428_v20, %v416_v45 }
 0x16a   :  { %v187_v56 = vsel %vm123_vm4, %v567_v11, %v175_v49  ;;  %v188_v57 = vsel %vm123_vm4, %v583_v16, %v176_v51  ;;  %v213_v16 = vsel %vm210_vm1, %v204_v62, %v205_v38  ;;  %v401_v49 = vsub.f32 %v647_v35, %v211_v36 }
 0x16b   :  { %v452_v61 = vsel %vm450_vm5, %v439_v53, 0.0  ;;  %v417_v63 = vmul.f32 %v187_v56, %v187_v56  ;;  %v418_v0 = vmul.f32 %v188_v57, %v188_v57  ;;  %v147_v1 = vpop.permute.xlu1 %146  ;;  %v149_v2 = vpop.permute.xlu0 %148  ;;  %v454_v6 = vsel %vm450_vm5, %v440_v54, 0.0 }
 0x16c   :  { %v453_v4 = vadd.f32 %v452_v61, %v451_v60  ;;  %v177_v5 = vsub.f32 %v587_v17, %v147_v1  ;;  %v178_v11 = vsub.f32 %v603_v22, %v149_v2  ;;  %v399_v27 = vsub.f32 %v627_v29, %v213_v16 }
 0x16d   :  { %v441_v8 = vadd.f32 %v429_v24, %v417_v63  ;;  %v442_v9 = vadd.f32 %v430_v47, %v418_v0  ;;  %v436_v51 = vmul.f32 %v412_v40, %v412_v40  ;;  %v437_v61 = vmul.f32 %v401_v49, %v401_v49 }
 0x16e   :  { %v455_v13 = vadd.f32 %v454_v6, %v453_v4  ;;  %v189_v14 = vsel %vm123_vm4, %v587_v17, %v177_v5  ;;  %v190_v15 = vsel %vm123_vm4, %v603_v22, %v178_v11  ;;  %v435_v46 = vmul.f32 %v399_v27, %v399_v27 }
 0x16f   :  { %v456_v62 = vsel %vm450_vm5, %v441_v8, 0.0  ;;  %v458_v19 = vsel %vm450_vm5, %v442_v9, 0.0  ;;  %v419_v20 = vmul.f32 %v189_v14, %v189_v14  ;;  %v420_v21 = vmul.f32 %v190_v15, %v190_v15  ;;  %v151_v24 = vpop.permute.xlu1 %150  ;;  %v153_v25 = vpop.permute.xlu0 %152 }
 0x170   :  { %v457_v26 = vadd.f32 %v456_v62, %v455_v13  ;;  %v179_v3 = vsub.f32 %v607_v23, %v151_v24  ;;  %v180_v17 = vsub.f32 %v623_v28, %v153_v25 }
 0x171   :  { %v443_v22 = vadd.f32 %v431_v52, %v419_v20  ;;  %v444_v30 = vadd.f32 %v432_v10, %v420_v21 }
 0x172   :  { %v459_v37 = vadd.f32 %v458_v19, %v457_v26  ;;  %v191_v38 = vsel %vm123_vm4, %v607_v23, %v179_v3  ;;  %v192_v39 = vsel %vm123_vm4, %v623_v28, %v180_v17 }
 0x173   :  { %v460_v42 = vsel %vm450_vm5, %v443_v22, 0.0  ;;  %v462_v43 = vsel %vm450_vm5, %v444_v30, 0.0  ;;  %v421_v44 = vmul.f32 %v191_v38, %v191_v38  ;;  %v422_v31 = vmul.f32 %v192_v39, %v192_v39  ;;  %v155_v32 = vpop.permute.xlu1 %154  ;;  %v157_v41 = vpop.permute.xlu0 %156 }
 0x174   :  { %v461_v45 = vadd.f32 %v460_v42, %v459_v37  ;;  %v181_v23 = vsub.f32 %v627_v29, %v155_v32  ;;  %v182_v47 = vsub.f32 %v643_v34, %v157_v41 }
 0x175   :  { %v445_v48 = vadd.f32 %v433_v55, %v421_v44  ;;  %v446_v28 = vadd.f32 %v434_v33, %v422_v31 }
 0x176   :  { %v463_v52 = vadd.f32 %v462_v43, %v461_v45  ;;  %v193_v10 = vsel %vm123_vm4, %v627_v29, %v181_v23  ;;  %v194_v53 = vsel %vm123_vm4, %v643_v34, %v182_v47 }
 0x177   :  { %v464_v54 = vsel %vm450_vm5, %v445_v48, 0.0  ;;  %v423_v7 = vmul.f32 %v193_v10, %v193_v10  ;;  %v424_v56 = vmul.f32 %v194_v53, %v194_v53  ;;  %v159_v57 = vpop.permute.xlu1 %158  ;;  %v466_v55 = vsel %vm450_vm5, %v446_v28, 0.0 }
 0x178   :  { %v183_v58 = vsub.f32 %v647_v35, %v159_v57  ;;  %v465_v59 = vadd.f32 %v464_v54, %v463_v52 }
 0x179   :  { %v447_v60 = vadd.f32 %v435_v46, %v423_v7  ;;  %v448_v63 = vadd.f32 %v436_v51, %v424_v56 }
 0x17a   :  { %v195_v29 = vsel %vm123_vm4, %v647_v35, %v183_v58  ;;  %v467_v0 = vadd.f32 %v466_v55, %v465_v59 }
 0x17b   :  { %v425_v1 = vmul.f32 %v195_v29, %v195_v29  ;;  %v468_v34 = vsel %vm450_vm5, %v447_v60, 0.0  ;;  %v470_v2 = vsel %vm450_vm5, %v448_v63, 0.0 }
 0x17c   :  { %v469_v4 = vadd.f32 %v468_v34, %v467_v0 }
 0x17d   :  { %v449_v5 = vadd.f32 %v437_v61, %v425_v1 }
 0x17e   :  { %v471_v11 = vadd.f32 %v470_v2, %v469_v4 }
 0x17f   :  { %v472_v16 = vsel %vm450_vm5, %v449_v5, 0.0 }
 0x180   :  { %v473_v6 = vadd.f32 %v472_v16, %v471_v11 }
 0x182   :  { %474 = vadd.xlane.f32.xlu0 %v473_v6 }
 0x20f   :  { %v475_v8 = vpop.xlane.xlu0 %474 }
 0x210   :  { %v476_v9 = vrot.slane %v475_v8, 4 }
 0x212   :  { %v477_v12 = vadd.f32 %v476_v9, %v475_v8 }
 0x214   :  { %v478_v13 = vrot.slane %v477_v12, 2 }
 0x216   :  { %v479_v14 = vadd.f32 %v478_v13, %v477_v12 }
 0x218   :  { %v480_v50 = vrot.slane %v479_v14, 1 }
 0x21a   :  { %v481_v35 = vadd.f32 %v480_v50, %v479_v14 }
 0x21c   :  { %498 = vpush %v481_v35 }
 0x24d   :  { %s499_s1 = spop %498 }
 0x24e   :  { %484 = sst [smem:[#allocation2]] %s499_s1 }
 0x24f   :  { %512 = shalt.err (!%p509_p2)
}
 0x250   :  { %s517_s9 = smov [#allocation2]  }
 0x251   :  { %492 = dma.smem_to_hbm %s517_s9, 16, %s885_s2, [#allocation3]  }
 0x252   :  { %513 = dma.done.wait [#allocation3], 16  }
 0x253   :  { %514 = vsyncadd [#allocation3], 4294967280 }
 0x254   :  { %496 = sfence }
 0x255   :  { %497 = vsyncpa [#allocation3], 1 }

</bundles_post_ra>
